<compile_context>
chip_gen: v6e
topology: v6e:2x2x1
jax: 0.10.0
libtpu: 0.0.40
codegen_flags: <defaults>
</compile_context>

<pallas_src>
import jax
import jax.numpy as jnp
from jax.experimental import pallas as pl
from jax.experimental.pallas import tpu as pltpu


def _round_up(x, m):
    return (x + m - 1) // m * m


def _causal_conv_kernel(x_ref, nb_ref, w0_ref, w1_ref, o_ref):
    """One (batch, time-tile) grid step.

    x_ref : (1, C_in, T_BLK)  input columns [t0, t0 + T_BLK)
    nb_ref: (1, C_in, 128)    neighbor block starting at column t0 + T_BLK
                              (clamped in-bounds; only column 0 is used)
    w0_ref: (C_out, C_in)     tap-0 weights  W[:, :, 0]
    w1_ref: (C_out, C_in)     tap-1 weights  W[:, :, 1]
    o_ref : (1, C_out, T_BLK) output columns [t0, t0 + T_BLK)
    """
    x = x_ref[0]                         # (C_in, T_BLK)
    nb = nb_ref[0][:, 0:1]               # (C_in, 1) == x[:, t0 + T_BLK]
    t_blk = x.shape[-1]

    # Second tap: x_shift[:, j] = x[:, j + 1].  Lane rotation goes to the XLU
    # (free next to the DMA-bound main loop); roll(shift=T_BLK-1) is equivalent
    # to jnp.roll(x, -1, axis=-1).  The wrapped-around last column is patched
    # with the neighbor tile's first column.
    x_rolled = pltpu.roll(x, shift=t_blk - 1, axis=1)
    lane = jax.lax.broadcasted_iota(jnp.int32, x.shape, dimension=1)
    x_shift = jnp.where(lane == t_blk - 1, nb, x_rolled)

    acc = jnp.dot(w0_ref[...], x, preferred_element_type=jnp.float32)
    acc = acc + jnp.dot(w1_ref[...], x_shift, preferred_element_type=jnp.float32)
    o_ref[0] = acc.astype(o_ref.dtype)


def _vmem_info():
    """Generation-aware (scoped VMEM limit to request, tile budget) in bytes."""
    try:
        cap = int(pltpu.get_tpu_info().vmem_capacity_bytes)
    except Exception:
        cap = 64 << 20  # conservative: v7x per-TensorCore VMEM
    vmem_limit = min(cap * 3 // 4, 100 << 20)   # ~48 MiB v7x, ~96 MiB v5e/v6e
    tile_budget = min(cap // 4, 24 << 20)       # ~16 MiB v7x, ~24 MiB v5e/v6e
    return int(vmem_limit), int(tile_budget)


def _pick_time_block(t_out, c_in, c_out, in_itemsize, out_itemsize,
                     budget_bytes, max_block):
    """Largest 128-multiple time block whose double-buffered tiles fit the budget."""
    blk = max(128, min(_round_up(max_block, 128), _round_up(t_out, 128)))
    fixed = 2 * (c_in * 128 * in_itemsize)          # neighbor block (double-buffered)
    fixed += 2 * (2 * c_out * c_in * in_itemsize)   # both weight tiles
    per_col = 2 * (c_in * in_itemsize + c_out * out_itemsize)
    while blk > 128 and fixed + per_col * blk > budget_bytes:
        blk = max(128, ((blk // 2) // 128) * 128)
    if fixed + per_col * blk > budget_bytes:
        # TODO(synk): add a C_out grid axis (tiled weights/output) to support very
        # large channel counts instead of refusing.
        raise ValueError(
            f"Channel dims too large for the untiled-channel kernel: "
            f"C_in={c_in}, C_out={c_out}")
    return blk


def causal_conv1d(x, weight, *, compute_dtype=jnp.bfloat16, max_time_block=4096):
    """WaveNet CausalConv1d forward: Conv1d(kernel_size=2, stride=1, bias=False).

    x: (B, C_in, T), weight: (C_out, C_in, 2)  ->  (B, C_out, T-1).

    compute_dtype: dtype for the in-kernel matmul operands (accumulation is f32;
    the output is cast back to x.dtype).  bf16 halves HBM bytes on this strictly
    memory-bound op; pass None to compute in the input dtype.
    """
    B, C_in, T = x.shape
    C_out, c_in_w, k = weight.shape
    if c_in_w != C_in or k != 2:
        raise ValueError(f"weight must be (C_out, {C_in}, 2); got {weight.shape}")
    if T < 2:
        raise ValueError("T must be >= 2 for a kernel_size=2 'valid' convolution")

    T_out = T - 1
    out_dtype = x.dtype

    if compute_dtype is not None:
        x = x.astype(compute_dtype)
        weight = weight.astype(compute_dtype)
    w0 = weight[:, :, 0]                 # (C_out, C_in)
    w1 = weight[:, :, 1]                 # (C_out, C_in)

    vmem_limit, tile_budget = _vmem_info()
    in_isz = jnp.dtype(x.dtype).itemsize
    out_isz = jnp.dtype(out_dtype).itemsize
    T_BLK = _pick_time_block(T_out, C_in, C_out, in_isz, out_isz,
                             tile_budget, max_time_block)
    n_t = pl.cdiv(T_out, T_BLK)

    # Neighbor block: the 128 input columns starting at element offset
    # (t + 1) * T_BLK, expressed in units of 128-column blocks.  Clamped so the
    # DMA never starts past the end of x; the clamp only triggers on the final
    # (partially masked) tile, where the neighbor column is not needed.
    k128 = T_BLK // 128
    nb_last_block = (T - 1) // 128

    def nb_index_map(b, t):
        return (b, 0, jnp.minimum((t + 1) * k128, nb_last_block))

    cost = pl.CostEstimate(
        flops=4 * B * C_out * C_in * T_out,
        transcendentals=0,
        bytes_accessed=int(x.size * in_isz + 2 * C_out * C_in * in_isz
                           + B * C_out * T_out * out_isz),
    )

    out = pl.pallas_call(
        _causal_conv_kernel,
        out_shape=jax.ShapeDtypeStruct((B, C_out, T_out), out_dtype),
        grid_spec=pltpu.PrefetchScalarGridSpec(
            num_scalar_prefetch=0,
            grid=(B, n_t),
            in_specs=[
                pl.BlockSpec((1, C_in, T_BLK), lambda b, t: (b, 0, t)),
                pl.BlockSpec((1, C_in, 128), nb_index_map),
                pl.BlockSpec((C_out, C_in), lambda b, t: (0, 0)),
                pl.BlockSpec((C_out, C_in), lambda b, t: (0, 0)),
            ],
            out_specs=pl.BlockSpec((1, C_out, T_BLK), lambda b, t: (b, 0, t)),
        ),
        compiler_params=pltpu.CompilerParams(
            dimension_semantics=("parallel", "parallel"),
            vmem_limit_bytes=vmem_limit,
        ),
        cost_estimate=cost,
    )(x, x, w0, w1)   # x is passed twice: full tiles + tiny neighbor blocks

    return out


def _reference_conv1d(x, weight):
    # Pure-JAX reference matching torch.nn.Conv1d(kernel_size=2, bias=False).
    return jax.lax.conv_general_dilated(
        x, weight,
        window_strides=(1,),
        padding="VALID",
        dimension_numbers=("NCH", "OIH", "NCH"),
    )


if __name__ == "__main__":
    B, C_in, C_out, T = 2, 4, 8, 16

    key = jax.random.PRNGKey(0)
    kx, kw = jax.random.split(key)
    x = jax.random.normal(kx, (B, C_in, T), dtype=jnp.float32)
    weight = jax.random.normal(kw, (C_out, C_in, 2), dtype=jnp.float32)

    # f32 compute path vs f32 reference (tolerance covers TPU default matmul precision).
    out_f32 = jax.block_until_ready(causal_conv1d(x, weight, compute_dtype=None))
    ref_f32 = _reference_conv1d(x, weight)
    assert out_f32.shape == (B, C_out, T - 1), out_f32.shape
    assert jnp.allclose(out_f32, ref_f32, atol=5e-2, rtol=5e-2), "f32 mismatch vs reference"

    # Default bf16 compute path vs a reference on bf16-rounded inputs.
    out_bf16 = jax.block_until_ready(causal_conv1d(x, weight))
    ref_bf16 = _reference_conv1d(
        x.astype(jnp.bfloat16).astype(jnp.float32),
        weight.astype(jnp.bfloat16).astype(jnp.float32))
    assert out_bf16.shape == (B, C_out, T - 1), out_bf16.shape
    assert jnp.allclose(out_bf16, ref_bf16, atol=5e-2, rtol=5e-2), "bf16 mismatch vs reference"

    print("KERNEL_OK")
</pallas_src>

<mosaic_0001>
module attributes {stable_mosaic.version = 11 : i64} {
  func.func @_causal_conv_kernel(%arg0: i32, %arg1: i32, %arg2: memref<1x4x128xf32, #tpu.memory_space<vmem>>, %arg3: memref<1x4x128xf32, #tpu.memory_space<vmem>>, %arg4: memref<8x4xf32, #tpu.memory_space<vmem>>, %arg5: memref<8x4xf32, #tpu.memory_space<vmem>>, %arg6: memref<1x8x128xf32, #tpu.memory_space<vmem>>) attributes {dimension_semantics = [#tpu.dimension_semantics<parallel>, #tpu.dimension_semantics<parallel>], iteration_bounds = array<i64: 2, 1>, scalar_prefetch = 0 : i64, scratch_operands = 0 : i64, tpu.core_type = #tpu.core_type<tc>, window_params = [{transform_indices = @transform_0, window_bounds = array<i64: 1, 4, 128>}, {transform_indices = @transform_1, window_bounds = array<i64: 1, 4, 128>}, {pipeline_mode = #tpu.pipeline_mode<synchronous>, transform_indices = @transform_2, window_bounds = array<i64: 8, 4>}, {pipeline_mode = #tpu.pipeline_mode<synchronous>, transform_indices = @transform_3, window_bounds = array<i64: 8, 4>}, {transform_indices = @transform_4, window_bounds = array<i64: 1, 8, 128>}]} {
    %c0 = arith.constant 0 : index
    %c0_0 = arith.constant 0 : index
    %c0_1 = arith.constant 0 : index
    %0 = vector.load %arg2[%c0, %c0_0, %c0_1] : memref<1x4x128xf32, #tpu.memory_space<vmem>>, vector<1x4x128xf32>
    %1 = vector.shape_cast %0 : vector<1x4x128xf32> to vector<4x128xf32>
    %c0_2 = arith.constant 0 : index
    %c0_3 = arith.constant 0 : index
    %c0_4 = arith.constant 0 : index
    %2 = vector.load %arg3[%c0_2, %c0_3, %c0_4] : memref<1x4x128xf32, #tpu.memory_space<vmem>>, vector<1x4x128xf32>
    %3 = vector.shape_cast %2 : vector<1x4x128xf32> to vector<4x128xf32>
    %4 = vector.extract_strided_slice %3 {offsets = [0, 0], sizes = [4, 1], strides = [1, 1]} : vector<4x128xf32> to vector<4x1xf32>
    %c127_i32 = arith.constant 127 : i32
    %5 = tpu.dynamic_rotate %1 by %c127_i32 dim 1 : vector<4x128xf32>, i32 -> vector<4x128xf32>
    %6 = tpu.iota {dimensions = array<i32: 1>} : vector<4x128xi32>
    %c127_i32_5 = arith.constant 127 : i32
    %7 = vector.broadcast %c127_i32_5 : i32 to vector<4x128xi32>
    %8 = arith.cmpi eq, %6, %7 : vector<4x128xi32>
    %9 = vector.shape_cast %4 : vector<4x1xf32> to vector<4x1xf32>
    %10 = vector.broadcast %9 : vector<4x1xf32> to vector<4x128xf32>
    %11 = arith.select %8, %10, %5 : vector<4x128xi1>, vector<4x128xf32>
    %c0_6 = arith.constant 0 : index
    %c0_7 = arith.constant 0 : index
    %12 = vector.load %arg4[%c0_6, %c0_7] : memref<8x4xf32, #tpu.memory_space<vmem>>, vector<8x4xf32>
    %cst = arith.constant dense<0.000000e+00> : vector<8x128xf32>
    %13 = tpu.matmul %12, %1, %cst {dimension_numbers = #tpu.dot_dimension_numbers<[1], [0], [0], [1], [0, 0, 1, 1], [], []>} : vector<8x4xf32>, vector<4x128xf32>, vector<8x128xf32> -> vector<8x128xf32>
    %c0_8 = arith.constant 0 : index
    %c0_9 = arith.constant 0 : index
    %14 = vector.load %arg5[%c0_8, %c0_9] : memref<8x4xf32, #tpu.memory_space<vmem>>, vector<8x4xf32>
    %cst_10 = arith.constant dense<0.000000e+00> : vector<8x128xf32>
    %15 = tpu.matmul %14, %11, %cst_10 {dimension_numbers = #tpu.dot_dimension_numbers<[1], [0], [0], [1], [0, 0, 1, 1], [], []>} : vector<8x4xf32>, vector<4x128xf32>, vector<8x128xf32> -> vector<8x128xf32>
    %16 = arith.addf %13, %15 : vector<8x128xf32>
    %c0_11 = arith.constant 0 : index
    %c0_12 = arith.constant 0 : index
    %c0_13 = arith.constant 0 : index
    %17 = vector.load %arg6[%c0_11, %c0_12, %c0_13] : memref<1x8x128xf32, #tpu.memory_space<vmem>>, vector<1x8x128xf32>
    %18 = vector.shape_cast %17 : vector<1x8x128xf32> to vector<8x128xf32>
    %19 = vector.shape_cast %16 : vector<8x128xf32> to vector<1x8x128xf32>
    tpu.vector_store %arg6[%c0_11, %c0_12, %c0_13], %19 {strides = array<i32>} : memref<1x8x128xf32, #tpu.memory_space<vmem>>, vector<1x8x128xf32>,
    return
  }
  func.func @transform_0(%arg0: i32, %arg1: i32) -> (i32, i32, i32) {
    %c0_i32 = arith.constant 0 : i32
    %c0_i32_0 = arith.constant 0 : i32
    return %arg0, %c0_i32, %arg1 : i32, i32, i32
  }
  func.func @transform_1(%arg0: i32, %arg1: i32) -> (i32, i32, i32) {
    %c1_i32 = arith.constant 1 : i32
    %0 = arith.addi %arg1, %c1_i32 : i32
    %c1_i32_0 = arith.constant 1 : i32
    %1 = arith.muli %0, %c1_i32_0 : i32
    %c0_i32 = arith.constant 0 : i32
    %2 = arith.minsi %1, %c0_i32 : i32
    %c0_i32_1 = arith.constant 0 : i32
    %c0_i32_2 = arith.constant 0 : i32
    return %arg0, %c0_i32_1, %2 : i32, i32, i32
  }
  func.func @transform_2(%arg0: i32, %arg1: i32) -> (i32, i32) {
    %c0_i32 = arith.constant 0 : i32
    %c0_i32_0 = arith.constant 0 : i32
    %c0_i32_1 = arith.constant 0 : i32
    return %c0_i32, %c0_i32_0 : i32, i32
  }
  func.func @transform_3(%arg0: i32, %arg1: i32) -> (i32, i32) {
    %c0_i32 = arith.constant 0 : i32
    %c0_i32_0 = arith.constant 0 : i32
    %c0_i32_1 = arith.constant 0 : i32
    return %c0_i32, %c0_i32_0 : i32, i32
  }
  func.func @transform_4(%arg0: i32, %arg1: i32) -> (i32, i32, i32) {
    %c0_i32 = arith.constant 0 : i32
    %c0_i32_0 = arith.constant 0 : i32
    return %arg0, %c0_i32, %arg1 : i32, i32, i32
  }
}

</mosaic_0001>

<bundles_post_ra>
// kernel: tpu_custom_call.1
= control target key start
LH: loop header
LB: loop body
LE: loop exit
PB: predicated region body
PF: predicated region fallthrough
CT: control target
= control target key end

     0   :  { %9 = vsyncpa [#allocation3], 0  ;;  %s852_s0 = inlined_call_operand.vmem [shape: f32[2,4,16], index: 0, kind: input, shape index: {}]   ;;  %s853_s1 = inlined_call_operand.vmem [shape: f32[2,4,16], index: 1, kind: input, shape index: {}]   ;;  %s854_s2 = inlined_call_operand.vmem [shape: f32[8,4], index: 2, kind: input, shape index: {}]   ;;  %s855_s3 = inlined_call_operand.vmem [shape: f32[8,4], index: 3, kind: input, shape index: {}]   ;;  %s856_s4 = inlined_call_operand.hbm [shape: f32[2,8,15], index: 4, kind: output, shape index: {}]  }
   0x1   :  { %11 = vsyncpa [#allocation3 + $0x1], 0  ;;  %s736_s15 = smov 0   ;;  %s738_s16 = smov 0  }
   0x2   :  { %s740_s17 = smov 0   ;;  %s742_s18 = smov 0  }
   0x3   :  { %s744_s19 = smov 0   ;;  %s746_s20 = smov 0  }
   0x4 LB: > { %s538_s21 = sadd.s32 4294967295, %s704_s20   ;;  %s539_s22 = sadd.s32 4294967294, %s704_s20   ;;  %s704_s20 = sphi %s746_s20, %s17_s20   ;;  %s700_s19 = sphi %s744_s19, %s863_s19   ;;  %s696_s18 = sphi %s742_s18, %s862_s18   ;;  %s692_s17 = sphi %s740_s17, %s861_s17   ;;  %s688_s16 = sphi %s738_s16, %s860_s16   ;;  %s684_s15 = sphi %s736_s15, %s859_s15  }
   0x5   : > { %s29_s23 = sadd.s32 1, %s700_s19  ;;  %s142_s24 = sadd.s32 1, %s692_s17 }
   0x6   : > { %p31_p0 = scmp.ge.s32.totalorder %s29_s23, 2  ;;  %p152_p1 = scmp.ne.s32.totalorder %s692_s17, %s688_s16 }
   0x7   : > { %p153_p2 = scmp.eq.s32.totalorder %s538_s21, 1  ;;  %p158_p3 = scmp.ne.s32.totalorder %s688_s16, %s684_s15 }
   0x8   : > { %s865_s23 = smov (%p31_p0, %s29_s23), 0  ;;  %p159_p5 = scmp.eq.s32.totalorder %s539_s22, 1 }
   0x9   : > { %p776_p4 = por %p153_p2, %p152_p1  ;;  %s137_s26 = ssub.s32 %s700_s19, %s865_s23 }
   0xa   : > { %p542_p6 = scmp.ge.s32.totalorder %s704_s20, 1  ;;  %p140_p7 = scmp.eq.s32.totalorder %s137_s26, 0 }
   0xb   : > { %p783_p8 = por %p159_p5, %p158_p3  ;;  %p209_p9 = scmp.lt.s32.totalorder %s704_s20, 3 }
   0xc   : > { %s789_s28 = scalar_select %p140_p7, %s692_s17, %s142_s24  }
   0xd   : > { %p210_p10 = pnand %p542_p6, %p209_p9 }
   0xe   : > { %p247_p11 = scmp.lt.s32.totalorder (!%p210_p10), %s696_s18, 1  ;;  %s709_s13 = smov (!%p210_p10), 127  }
   0xf   : > { %213 = sbr.rel (%p210_p10) target bundleno = 363 (0x16b), region = 36  ;;  %s244_s22 = sand.u32 (!%p210_p10), 1, %s688_s16  }
  0x10   : > { %s543_s24 = sshll.u32 (!%p210_p10), %s244_s22, 3  ;;  %s551_s26 = sshll.u32 (!%p210_p10), %s696_s18, 7 }
  0x11   : > { %s438_s8 = scalar_lea.sflag (!%p210_p10), [#allocation3], %s244_s22 }
  0x14   : > { %v706_v0 = vmov 0   ;;  %s248_s29 = scalar_select %p247_p11, %s696_s18, 1  ;;  %v707_v1 = vmov 0.0   ;;  %vm708_vm0 = vmmov 0   ;;  %vm286_vm1 = vcmask 1043456   ;;  %v280_v4 = vld [vmem:[%s854_s2] sm:$0xff] }
  0x15   : > { %627 = vset.pattern.permute.xlu0 %v706_v0  ;;  %563 = vmatprep.subr.mxu1 %v707_v1  ;;  %vm282_vm2 = vcmask 31744   ;;  %v271_v5 = vlaneseq  ;;  %v281_v9 = vld [vmem:[%s855_s3] sm:$0xff] }
  0x16   : > { %565 = vmatprep.mubr.msk.f32.mxu1 %vm708_vm0, %v707_v1  ;;  %s544_s30 = sshll.u32 %s248_s29, 2  ;;  %558 = vmatprep.subr.mxu0 %v707_v1  ;;  %s246_s29 = scalar_lea.vmem [#allocation2], %s543_s24 }
  0x17   : > { %560 = vmatprep.mubr.msk.f32.mxu0 %vm708_vm0, %v707_v1  ;;  %s263_s7 = scalar_lea.vmem %s853_s1, %s544_s30  ;;  %s253_s10 = scalar_lea.vmem %s852_s0, %s544_s30  ;;  %v272_v6 = vand.u32 127, %v271_v5 }
  0x18   : > { %v268_v2 = vld [vmem:[%s263_s7] sm:$0xf]  ;;  %s452_s30 = sshll.u32 %s246_s29, 4  ;;  %s812_s7 = scalar_lea.hbm %s856_s4, %s551_s26  ;;  %s453_s30 = int_to_ptr.vmem [resolvable:$true] %s452_s30 }
  0x19   : > { %v267_v3 = vld [vmem:[%s253_s10] sm:$0xf]  ;;  %276 = vperm.xlu0 %627, %v268_v2   ;;  %vm273_vm3 = vcmp.eq.s32.totalorder %v272_v6, 127  ;;  %s628_s9 = scalar_lea.vmem %s453_s30, 128  ;;  %s710_s10 = smov [#allocation2]  }
  0x1a   : > { %564 = vmatpush3.msk.msra.mxu1 %vm286_vm1, %v267_v3  ;;  %p629_p12 = scmp.ne.s32.totalorder %s453_s30, %s628_s9  ;;  %s632_s18 = sshll.u32 %s710_s10, 4  ;;  %s633_s18 = int_to_ptr.vmem [resolvable:$false] %s632_s18 }
  0x1b   : > { %566 = vmatmul.mubr.msk.f32.vlgmr.msra.gmra.mxu1 %vm282_vm2, %v280_v4  ;;  %s634_s11 = scalar_lea.vmem %s633_s18, 256  ;;  %p635_p1 = scmp.lt.s32.totalorder %s453_s30, %s633_s18 }
  0x1c   : > { %p630_p13 = pnand %p629_p12, %p776_p4  ;;  %p636_p2 = scmp.lt.s32.totalorder %s634_s11, %s628_s9 }
  0x1d   : > { %269 = vrot.lane.b32.xlu0 %v267_v3, %s709_s13 }
  0x1e   : > { %p631_p0 = pneg %p630_p13  ;;  %p637_p3 = por %p636_p2, %p635_p1 }
  0x20   : > { %p638_p5 = pnand %p637_p3, %p631_p0 }
  0x94   : > { %v277_v7 = vpop.permute.xlu0 %276 }
  0x98   : > { %v270_v8 = vpop.permute.xlu0 %269 }
  0x99   : > { %v279_v10 = vsel %vm273_vm3, %v277_v7, %v270_v8 }
  0x9a   : > { %559 = vmatpush3.msk.msra.mxu0 %vm286_vm1, %v279_v10 }
  0x9b   : > { %561 = vmatmul.mubr.msk.f32.vlgmr.msra.gmra.mxu0 %vm282_vm2, %v281_v9 }
  0xdb   : > { %v432_v11 = vpop.f32.mrf.mxu1 }
  0xdd   : > { %v567_v12 = vpop.f32.mrf.mxu1 }
 0x15b   : > { %v356_v13 = vpop.f32.mrf.mxu0 }
 0x15c   : > { %v433_v14 = vadd.f32 %v432_v11, %v356_v13 }
 0x15d   : > { %v562_v15 = vpop.f32.mrf.mxu0 }
 0x15e   : > { %436 = vst [vmem:[%s246_s29] sm:$0xff] %v433_v14 }
 0x15f   : > { %641 = shalt.err (!%p638_p5)
}
 0x160   : > { %s642_s12 = scalar_lea.hbm %s812_s7, 128  ;;  %s646_s21 = scalar_lea.hbm %s856_s4, 256 }
 0x161   : > { %p643_p6 = scmp.ne.s32.totalorder %s812_s7, %s642_s12  ;;  %p647_p10 = scmp.lt.s32.totalorder %s812_s7, %s856_s4 }
 0x162   : > { %p648_p11 = scmp.lt.s32.totalorder %s646_s21, %s642_s12 }
 0x163   : > { %p644_p7 = pnand %p643_p6, %p776_p4 }
 0x164   : > { %p649_p12 = por %p648_p11, %p647_p10 }
 0x165   : > { %p645_p9 = pneg %p644_p7 }
 0x167   : > { %p650_p13 = pnand %p649_p12, %p645_p9 }
 0x169   : > { %653 = shalt.err (!%p650_p13)
}
 0x16a   : > { %568 = dma.vmem_to_hbm [thread:$0]  (%p776_p4), %s453_s30, 128, %s812_s7, %s438_s8  }
 0x16b PF: > { %p574_p0 = scmp.ge.s32.totalorder %s704_s20, 2  ;;  %s464_s26 = sand.u32 1, %s684_s15  }
 0x16c   : > { %s465_s29 = scalar_lea.sflag [#allocation3], %s464_s26 }
 0x16d   : > { %p571_p1 = pnand %p574_p0, %p783_p8 }
 0x16f   : > { %p572_p2 = pneg %p571_p1 }
 0x171   : > { %679 = dma.done.wait (%p572_p2), %s465_s29, 128  }
 0x172   : > { %681 = vsyncadd (%p572_p2), %s465_s29, 4294967168  ;;  %s17_s20 = sadd.s32 1, %s704_s20   ;;  %s859_s15 = smov %s688_s16 }
 0x173   : > { %p14_p3 = scmp.ge.s32.totalorder %s17_s20, 4   ;;  %s860_s16 = smov %s692_s17 }
 0x174   : > { %s861_s17 = smov %s789_s28  ;;  %s862_s18 = smov %s700_s19 }
 0x175   : > { %s863_s19 = smov %s865_s23  ;;  %16 = sbr.rel (!%p14_p3) target bundleno = 4 (0x4), region = 74 }
 0x17a   :  { %470 = vsyncpa [#allocation3], 1 }
 0x17b   :  { %472 = vsyncpa [#allocation3 + $0x1], 1 }

</bundles_post_ra>
